<compile_context>
chip_gen: v7x
topology: tpu7x:2x2x1
jax: 0.10.0
libtpu: 0.0.40
codegen_flags: <defaults>
</compile_context>

<pallas_src>
import functools

import jax
import jax.numpy as jnp
from jax.experimental import pallas as pl
from jax.experimental.pallas import tpu as pltpu


_SQRT_HALF = 0.7071067811865476


# ------------------------------ in-kernel math ------------------------------

def _ln(x, g, b, eps):
    mu = jnp.mean(x, axis=-1, keepdims=True)
    xc = x - mu
    var = jnp.mean(xc * xc, axis=-1, keepdims=True)
    return xc * jax.lax.rsqrt(var + eps) * g + b


def _gelu(x):
    # exact (erf) GELU, matching torch.nn.GELU default.
    # TODO(synk): on v5e the erf polynomial is pure VALU work; the tanh
    # approximation would land on the idle EUP slot if tolerance allows.
    return 0.5 * x * (1.0 + jax.lax.erf(x * _SQRT_HALF))


# ------------------------ the single fused network kernel -------------------
# grid = (batch_chunks ["parallel"], depth ["arbitrary"])
#   d == 0        : patch embed (conv-as-matmul + bias + LN + pos) -> scratch
#   every d       : one MLPBlock applied to the VMEM-resident activation
#   d == depth-1  : final LN + token-mean (pool matmul) + classifier -> logits

def _pure_mlp_kernel(xp_ref, pw_ref, pvec_ref, pos_ref, pool_ref,
                     smT_ref, vec_ref, fc1b_ref, fc1w_ref, fc2w_ref,
                     nvec_ref, hw_ref, hb_ref,
                     o_ref, t_ref, *, eps, bt, n):
    d = pl.program_id(1)

    # --- patch embed: only at the first depth step for this batch chunk ---
    @pl.when(d == 0)
    def _():
        xp = xp_ref[0].astype(jnp.bfloat16)                       # (BT*n, K)
        pv = pvec_ref[...]                                        # (3, C) f32
        y = jnp.dot(xp, pw_ref[...], preferred_element_type=jnp.float32)
        y = _ln(y + pv[0:1], pv[1:2], pv[2:3], eps)
        t_ref[...] = y + pos_ref[...]

    # --- one MLPBlock; weights for block d arrive via depth-indexed specs ---
    t = t_ref[...]                                                # (BT*n, C) f32
    vec = vec_ref[0]                                              # (7, C) f32
    # [0]=ln1_g [1]=ln1_b [2]=gamma1 [3]=ln2_g [4]=ln2_b [5]=gamma2 [6]=fc2_b

    # token mixing: out = softmax(w, src-axis)^T @ LN1(t), per folded batch
    y = _ln(t, vec[0:1], vec[1:2], eps).astype(jnp.bfloat16)
    smT = smT_ref[0].astype(jnp.bfloat16)                         # (n, n)
    mixed = jnp.concatenate(
        [jnp.dot(smT, y[b * n:(b + 1) * n],
                 preferred_element_type=jnp.float32) for b in range(bt)],
        axis=0)                                                   # (BT*n, C) f32
    t = t + vec[2:3] * mixed

    # channel MLP: LN2 -> fc1 -> GELU -> fc2 (batch folded into matmul rows)
    z = _ln(t, vec[3:4], vec[4:5], eps)
    h = jnp.dot(z.astype(jnp.bfloat16), fc1w_ref[0],
                preferred_element_type=jnp.float32) + fc1b_ref[0]
    h = _gelu(h)
    z2 = jnp.dot(h.astype(jnp.bfloat16), fc2w_ref[0],
                 preferred_element_type=jnp.float32) + vec[6:7]
    t = t + vec[5:6] * z2
    t_ref[...] = t

    # --- head: final LN + token mean + classifier, only after last block ---
    @pl.when(d == pl.num_programs(1) - 1)
    def _():
        nv = nvec_ref[...]                                        # (2, C)
        yf = _ln(t, nv[0:1], nv[1:2], eps)
        feat = jnp.dot(pool_ref[...], yf,
                       preferred_element_type=jnp.float32)        # (BT, C)
        logits = jnp.dot(feat.astype(jnp.bfloat16), hw_ref[...],
                         preferred_element_type=jnp.float32) + hb_ref[...]
        o_ref[0] = logits.astype(o_ref.dtype)


# ------------------------------ VMEM budgeting ------------------------------

def _padded_block_bytes(shape, dtype):
    """Bytes of one VMEM buffer for a block, padded to (8, 128) tiles."""
    lead = 1
    for s in shape[:-2]:
        lead *= int(s)
    rows = int(shape[-2]) if len(shape) >= 2 else 1
    cols = int(shape[-1])
    rows_p = -(-rows // 8) * 8
    cols_p = -(-cols // 128) * 128
    return lead * rows_p * cols_p * jnp.dtype(dtype).itemsize


# -------------------------------- forward pass -------------------------------

def pure_mlp_forward(params, x, *, patch, eps=1e-6):
    B, Cin, Himg, Wimg = x.shape
    Hp, Wp = Himg // patch, Wimg // patch
    n = Hp * Wp
    K = Cin * patch * patch
    C = params["patch_w"].shape[1]
    blocks = params["blocks"]
    depth = len(blocks)
    Hd = blocks[0]["fc1_w"].shape[1]
    NC = params["head_w"].shape[1]

    # Batch folding: BT batches folded into the matmul row dim; keep G >= 2
    # chunks on the leading "parallel" grid axis so v7x megacore shards it.
    if B % 2 == 0:
        G, BT = 2, B // 2
    else:
        G, BT = B, 1
    R = BT * n                                   # folded row count per tile

    # --- patch extraction (layout glue; order matches torch Conv2d weight) ---
    # TODO(synk): at production image sizes fuse this transpose into the
    # patch-embed DMA (grid over (B, Hp) row-slabs) instead of a separate op.
    xp = (x.reshape(B, Cin, Hp, patch, Wp, patch)
           .transpose(0, 2, 4, 1, 3, 5)
           .reshape(G, R, K))

    # --- tiny host-side prep, hoisted out of the grid loop ---
    # SpatialMLP mode='softmax': softmax over the source-token axis (torch
    # dim=1 of the (num_heads, n, n) weight), pre-transposed so the kernel
    # does a plain (n, n) @ (n, C) matmul.
    smT = jnp.stack([jax.nn.softmax(b["sp_w"], axis=0).T for b in blocks])
    vecC = jnp.stack([jnp.stack([b["ln1_g"], b["ln1_b"], b["gamma1"],
                                 b["ln2_g"], b["ln2_b"], b["gamma2"],
                                 b["fc2_b"]]) for b in blocks])          # (D,7,C)
    fc1b = jnp.stack([b["fc1_b"] for b in blocks])[:, None, :]           # (D,1,H)
    fc1w = jnp.stack([b["fc1_w"] for b in blocks]).astype(jnp.bfloat16)  # (D,C,H)
    fc2w = jnp.stack([b["fc2_w"] for b in blocks]).astype(jnp.bfloat16)  # (D,H,C)

    pw = params["patch_w"].astype(jnp.bfloat16)                          # (K, C)
    pvec = jnp.stack([params["patch_b"], params["patch_ln_g"],
                      params["patch_ln_b"]])                             # (3, C)
    pos_t = jnp.tile(params["pos_embed"].reshape(n, C), (BT, 1))         # (R, C)
    pool = jnp.kron(jnp.eye(BT, dtype=jnp.float32),
                    jnp.full((1, n), 1.0 / n, jnp.float32))              # (BT, R)
    nvec = jnp.stack([params["norm_g"], params["norm_b"]])               # (2, C)
    hw = params["head_w"].astype(jnp.bfloat16)                           # (C, NC)
    hb = params["head_b"].reshape(1, NC)

    const = lambda shape: pl.BlockSpec(shape, lambda g, d: (0,) * len(shape))
    per_d = lambda shape: pl.BlockSpec((1,) + shape, lambda g, d: (d, 0, 0))

    in_specs = [
        pl.BlockSpec((1, R, K), lambda g, d: (g, 0, 0)),   # xp (per batch chunk)
        const((K, C)),                                     # patch weight (bf16)
        const((3, C)),                                     # patch bias + LN
        const((R, C)),                                     # pos embed (tiled)
        const((BT, R)),                                    # token-mean pooling
        per_d((n, n)),                                     # softmax^T mix weight
        per_d((7, C)),                                     # packed (C,) vectors
        per_d((1, Hd)),                                    # fc1 bias
        per_d((C, Hd)),                                    # fc1 weight (bf16)
        per_d((Hd, C)),                                    # fc2 weight (bf16)
        const((2, C)),                                     # final LN
        const((C, NC)),                                    # head weight (bf16)
        const((1, NC)),                                    # head bias
    ]
    out_spec = pl.BlockSpec((1, BT, NC), lambda g, d: (g, 0, 0))

    # VMEM budget: double-buffered padded block bytes + scratch + headroom,
    # capped at 64 MiB so it is safe on v7x and generous on v5e/v6e.
    blocks_for_budget = [
        ((1, R, K), xp.dtype), ((K, C), pw.dtype), ((3, C), pvec.dtype),
        ((R, C), pos_t.dtype), ((BT, R), pool.dtype), ((1, n, n), smT.dtype),
        ((1, 7, C), vecC.dtype), ((1, 1, Hd), fc1b.dtype),
        ((1, C, Hd), fc1w.dtype), ((1, Hd, C), fc2w.dtype),
        ((2, C), nvec.dtype), ((C, NC), hw.dtype), ((1, NC), hb.dtype),
        ((1, BT, NC), jnp.float32),
    ]
    vmem_bytes = sum(2 * _padded_block_bytes(s, dt) for s, dt in blocks_for_budget)
    vmem_bytes += _padded_block_bytes((R, C), jnp.float32)      # scratch
    vmem_limit = int(min(max(2 * vmem_bytes + (8 << 20), 16 << 20), 64 << 20))

    logits = pl.pallas_call(
        functools.partial(_pure_mlp_kernel, eps=eps, bt=BT, n=n),
        out_shape=jax.ShapeDtypeStruct((G, BT, NC), jnp.float32),
        grid_spec=pltpu.PrefetchScalarGridSpec(
            num_scalar_prefetch=0,
            grid=(G, depth),
            in_specs=in_specs,
            out_specs=out_spec,
            scratch_shapes=[pltpu.VMEM((R, C), jnp.float32)]),
        compiler_params=pltpu.CompilerParams(
            dimension_semantics=("parallel", "arbitrary"),
            vmem_limit_bytes=vmem_limit),
    )(xp, pw, pvec, pos_t, pool, smT, vecC, fc1b, fc1w, fc2w, nvec, hw, hb)

    return logits.reshape(B, NC)


# ------------------------- parameters (deterministic) -----------------------

def init_params(key, *, in_chans, patch, embed_dim, n, depth, hidden, num_classes):
    keys = iter(jax.random.split(key, 8 + 4 * depth))

    def nrm(shape, std=0.02):
        return jax.random.normal(next(keys), shape, jnp.float32) * std

    side = int(n ** 0.5)
    p = {
        # conv proj as a matmul: weight flattened (in_chans*ph*pw, embed_dim)
        "patch_w": nrm((in_chans * patch * patch, embed_dim)),
        "patch_b": jnp.zeros((embed_dim,), jnp.float32),
        "patch_ln_g": jnp.ones((embed_dim,), jnp.float32),
        "patch_ln_b": jnp.zeros((embed_dim,), jnp.float32),
        "pos_embed": nrm((1, side, side, embed_dim)),
        "norm_g": jnp.ones((embed_dim,), jnp.float32),
        "norm_b": jnp.zeros((embed_dim,), jnp.float32),
        "head_w": nrm((embed_dim, num_classes)),
        "head_b": jnp.zeros((num_classes,), jnp.float32),
        "blocks": [],
    }
    for _ in range(depth):
        p["blocks"].append(dict(
            ln1_g=jnp.ones((embed_dim,), jnp.float32),
            ln1_b=jnp.zeros((embed_dim,), jnp.float32),
            sp_w=nrm((n, n)),                                   # num_heads = 1
            ln2_g=jnp.ones((embed_dim,), jnp.float32),
            ln2_b=jnp.zeros((embed_dim,), jnp.float32),
            fc1_w=nrm((embed_dim, hidden)),
            fc1_b=jnp.zeros((hidden,), jnp.float32),
            fc2_w=nrm((hidden, embed_dim)),
            fc2_b=jnp.zeros((embed_dim,), jnp.float32),
            gamma1=jnp.full((embed_dim,), 1e-3, jnp.float32),   # init_values=0.001
            gamma2=jnp.full((embed_dim,), 1e-3, jnp.float32),
        ))
    return p


# ------------------------------------ main -----------------------------------

if __name__ == "__main__":
    # Small, consistent config: img 32x32, patch 8 -> h=w=4, n=16 tokens.
    B, Cin, IMG, PATCH = 2, 3, 32, 8
    EMBED, DEPTH, NUM_CLASSES = 32, 2, 10
    MLP_RATIO = 4
    N_TOKENS = (IMG // PATCH) ** 2
    HIDDEN = EMBED * MLP_RATIO

    root = jax.random.PRNGKey(0)
    k_x, k_p = jax.random.split(root)
    x = jax.random.normal(k_x, (B, Cin, IMG, IMG), jnp.float32)

    params = init_params(k_p, in_chans=Cin, patch=PATCH, embed_dim=EMBED,
                         n=N_TOKENS, depth=DEPTH, hidden=HIDDEN,
                         num_classes=NUM_CLASSES)

    fwd = jax.jit(functools.partial(pure_mlp_forward, patch=PATCH))
    logits = fwd(params, x)
    jax.block_until_ready(logits)
    assert logits.shape == (B, NUM_CLASSES)
    print("KERNEL_OK")
</pallas_src>

<mosaic_0001>
module attributes {stable_mosaic.version = 11 : i64} {
  func.func @_pure_mlp_kernel(%arg0: i32, %arg1: i32, %arg2: memref<1x16x192xf32, #tpu.memory_space<vmem>>, %arg3: memref<192x32xbf16, #tpu.memory_space<vmem>>, %arg4: memref<3x32xf32, #tpu.memory_space<vmem>>, %arg5: memref<16x32xf32, #tpu.memory_space<vmem>>, %arg6: memref<1x16xf32, #tpu.memory_space<vmem>>, %arg7: memref<1x16x16xf32, #tpu.memory_space<vmem>>, %arg8: memref<1x7x32xf32, #tpu.memory_space<vmem>>, %arg9: memref<1x1x128xf32, #tpu.memory_space<vmem>>, %arg10: memref<1x32x128xbf16, #tpu.memory_space<vmem>>, %arg11: memref<1x128x32xbf16, #tpu.memory_space<vmem>>, %arg12: memref<2x32xf32, #tpu.memory_space<vmem>>, %arg13: memref<32x10xbf16, #tpu.memory_space<vmem>>, %arg14: memref<1x10xf32, #tpu.memory_space<vmem>>, %arg15: memref<1x1x10xf32, #tpu.memory_space<vmem>>, %arg16: memref<16x32xf32, #tpu.memory_space<vmem>>) attributes {dimension_semantics = [#tpu.dimension_semantics<parallel>, #tpu.dimension_semantics<arbitrary>], iteration_bounds = array<i64: 2, 2>, scalar_prefetch = 0 : i64, scratch_operands = 1 : i64, tpu.core_type = #tpu.core_type<tc>, window_params = [{transform_indices = @transform_0, window_bounds = array<i64: 1, 16, 192>}, {pipeline_mode = #tpu.pipeline_mode<synchronous>, transform_indices = @transform_1, window_bounds = array<i64: 192, 32>}, {pipeline_mode = #tpu.pipeline_mode<synchronous>, transform_indices = @transform_2, window_bounds = array<i64: 3, 32>}, {pipeline_mode = #tpu.pipeline_mode<synchronous>, transform_indices = @transform_3, window_bounds = array<i64: 16, 32>}, {pipeline_mode = #tpu.pipeline_mode<synchronous>, transform_indices = @transform_4, window_bounds = array<i64: 1, 16>}, {transform_indices = @transform_5, window_bounds = array<i64: 1, 16, 16>}, {transform_indices = @transform_6, window_bounds = array<i64: 1, 7, 32>}, {transform_indices = @transform_7, window_bounds = array<i64: 1, 1, 128>}, {transform_indices = @transform_8, window_bounds = array<i64: 1, 32, 128>}, {transform_indices = @transform_9, window_bounds = array<i64: 1, 128, 32>}, {pipeline_mode = #tpu.pipeline_mode<synchronous>, transform_indices = @transform_10, window_bounds = array<i64: 2, 32>}, {pipeline_mode = #tpu.pipeline_mode<synchronous>, transform_indices = @transform_11, window_bounds = array<i64: 32, 10>}, {pipeline_mode = #tpu.pipeline_mode<synchronous>, transform_indices = @transform_12, window_bounds = array<i64: 1, 10>}, {transform_indices = @transform_13, window_bounds = array<i64: 1, 1, 10>}]} {
    %c0_i32 = arith.constant 0 : i32
    %0 = arith.cmpi eq, %arg1, %c0_i32 : i32
    %1 = arith.extui %0 : i1 to i32
    %c0_i32_0 = arith.constant 0 : i32
    %2 = arith.cmpi ne, %1, %c0_i32_0 : i32
    scf.if %2 {
      %c0_35 = arith.constant 0 : index
      %c0_36 = arith.constant 0 : index
      %c0_37 = arith.constant 0 : index
      %90 = vector.load %arg2[%c0_35, %c0_36, %c0_37] : memref<1x16x192xf32, #tpu.memory_space<vmem>>, vector<1x16x192xf32>
      %91 = vector.shape_cast %90 : vector<1x16x192xf32> to vector<16x192xf32>
      %92 = arith.truncf %91 : vector<16x192xf32> to vector<16x192xbf16>
      %c0_38 = arith.constant 0 : index
      %c0_39 = arith.constant 0 : index
      %93 = vector.load %arg4[%c0_38, %c0_39] : memref<3x32xf32, #tpu.memory_space<vmem>>, vector<3x32xf32>
      %c0_40 = arith.constant 0 : index
      %c0_41 = arith.constant 0 : index
      %94 = vector.load %arg3[%c0_40, %c0_41] : memref<192x32xbf16, #tpu.memory_space<vmem>>, vector<192x32xbf16>
      %cst_42 = arith.constant dense<0.000000e+00> : vector<16x32xf32>
      %95 = tpu.matmul %92, %94, %cst_42 {dimension_numbers = #tpu.dot_dimension_numbers<[1], [0], [0], [1], [0, 0, 1, 1], [], []>} : vector<16x192xbf16>, vector<192x32xbf16>, vector<16x32xf32> -> vector<16x32xf32>
      %96 = vector.extract_strided_slice %93 {offsets = [0, 0], sizes = [1, 32], strides = [1, 1]} : vector<3x32xf32> to vector<1x32xf32>
      %97 = vector.broadcast %96 : vector<1x32xf32> to vector<16x32xf32>
      %98 = arith.addf %95, %97 : vector<16x32xf32>
      %99 = vector.extract_strided_slice %93 {offsets = [1, 0], sizes = [1, 32], strides = [1, 1]} : vector<3x32xf32> to vector<1x32xf32>
      %100 = vector.extract_strided_slice %93 {offsets = [2, 0], sizes = [1, 32], strides = [1, 1]} : vector<3x32xf32> to vector<1x32xf32>
      %cst_43 = arith.constant dense<0.000000e+00> : vector<16xf32>
      %101 = vector.multi_reduction <add>, %98, %cst_43 [1] : vector<16x32xf32> to vector<16xf32>
      %102 = vector.shape_cast %101 : vector<16xf32> to vector<16x1xf32>
      %cst_44 = arith.constant 3.200000e+01 : f32
      %103 = vector.broadcast %cst_44 : f32 to vector<16x1xf32>
      %104 = arith.divf %102, %103 : vector<16x1xf32>
      %105 = vector.broadcast %104 : vector<16x1xf32> to vector<16x32xf32>
      %106 = arith.subf %98, %105 : vector<16x32xf32>
      %107 = arith.mulf %106, %106 : vector<16x32xf32>
      %cst_45 = arith.constant dense<0.000000e+00> : vector<16xf32>
      %108 = vector.multi_reduction <add>, %107, %cst_45 [1] : vector<16x32xf32> to vector<16xf32>
      %109 = vector.shape_cast %108 : vector<16xf32> to vector<16x1xf32>
      %cst_46 = arith.constant 3.200000e+01 : f32
      %110 = vector.broadcast %cst_46 : f32 to vector<16x1xf32>
      %111 = arith.divf %109, %110 : vector<16x1xf32>
      %cst_47 = arith.constant 9.99999997E-7 : f32
      %112 = vector.broadcast %cst_47 : f32 to vector<16x1xf32>
      %113 = arith.addf %111, %112 : vector<16x1xf32>
      %114 = math.rsqrt %113 : vector<16x1xf32>
      %115 = vector.broadcast %114 : vector<16x1xf32> to vector<16x32xf32>
      %116 = arith.mulf %106, %115 : vector<16x32xf32>
      %117 = vector.broadcast %99 : vector<1x32xf32> to vector<16x32xf32>
      %118 = arith.mulf %116, %117 : vector<16x32xf32>
      %119 = vector.broadcast %100 : vector<1x32xf32> to vector<16x32xf32>
      %120 = arith.addf %118, %119 : vector<16x32xf32>
      %c0_48 = arith.constant 0 : index
      %c0_49 = arith.constant 0 : index
      %121 = vector.load %arg5[%c0_48, %c0_49] : memref<16x32xf32, #tpu.memory_space<vmem>>, vector<16x32xf32>
      %122 = arith.addf %120, %121 : vector<16x32xf32>
      %c0_50 = arith.constant 0 : index
      %c0_51 = arith.constant 0 : index
      %123 = vector.load %arg16[%c0_50, %c0_51] : memref<16x32xf32, #tpu.memory_space<vmem>>, vector<16x32xf32>
      tpu.vector_store %arg16[%c0_50, %c0_51], %122 {strides = array<i32>} : memref<16x32xf32, #tpu.memory_space<vmem>>, vector<16x32xf32>,
    } else {
    }
    %c0 = arith.constant 0 : index
    %c0_1 = arith.constant 0 : index
    %3 = vector.load %arg16[%c0, %c0_1] : memref<16x32xf32, #tpu.memory_space<vmem>>, vector<16x32xf32>
    %c0_2 = arith.constant 0 : index
    %c0_3 = arith.constant 0 : index
    %c0_4 = arith.constant 0 : index
    %4 = vector.load %arg8[%c0_2, %c0_3, %c0_4] : memref<1x7x32xf32, #tpu.memory_space<vmem>>, vector<1x7x32xf32>
    %5 = vector.shape_cast %4 : vector<1x7x32xf32> to vector<7x32xf32>
    %6 = vector.extract_strided_slice %5 {offsets = [0, 0], sizes = [1, 32], strides = [1, 1]} : vector<7x32xf32> to vector<1x32xf32>
    %7 = vector.extract_strided_slice %5 {offsets = [1, 0], sizes = [1, 32], strides = [1, 1]} : vector<7x32xf32> to vector<1x32xf32>
    %cst = arith.constant dense<0.000000e+00> : vector<16xf32>
    %8 = vector.multi_reduction <add>, %3, %cst [1] : vector<16x32xf32> to vector<16xf32>
    %9 = vector.shape_cast %8 : vector<16xf32> to vector<16x1xf32>
    %cst_5 = arith.constant 3.200000e+01 : f32
    %10 = vector.broadcast %cst_5 : f32 to vector<16x1xf32>
    %11 = arith.divf %9, %10 : vector<16x1xf32>
    %12 = vector.broadcast %11 : vector<16x1xf32> to vector<16x32xf32>
    %13 = arith.subf %3, %12 : vector<16x32xf32>
    %14 = arith.mulf %13, %13 : vector<16x32xf32>
    %cst_6 = arith.constant dense<0.000000e+00> : vector<16xf32>
    %15 = vector.multi_reduction <add>, %14, %cst_6 [1] : vector<16x32xf32> to vector<16xf32>
    %16 = vector.shape_cast %15 : vector<16xf32> to vector<16x1xf32>
    %cst_7 = arith.constant 3.200000e+01 : f32
    %17 = vector.broadcast %cst_7 : f32 to vector<16x1xf32>
    %18 = arith.divf %16, %17 : vector<16x1xf32>
    %cst_8 = arith.constant 9.99999997E-7 : f32
    %19 = vector.broadcast %cst_8 : f32 to vector<16x1xf32>
    %20 = arith.addf %18, %19 : vector<16x1xf32>
    %21 = math.rsqrt %20 : vector<16x1xf32>
    %22 = vector.broadcast %21 : vector<16x1xf32> to vector<16x32xf32>
    %23 = arith.mulf %13, %22 : vector<16x32xf32>
    %24 = vector.broadcast %6 : vector<1x32xf32> to vector<16x32xf32>
    %25 = arith.mulf %23, %24 : vector<16x32xf32>
    %26 = vector.broadcast %7 : vector<1x32xf32> to vector<16x32xf32>
    %27 = arith.addf %25, %26 : vector<16x32xf32>
    %28 = arith.truncf %27 : vector<16x32xf32> to vector<16x32xbf16>
    %c0_9 = arith.constant 0 : index
    %c0_10 = arith.constant 0 : index
    %c0_11 = arith.constant 0 : index
    %29 = vector.load %arg7[%c0_9, %c0_10, %c0_11] : memref<1x16x16xf32, #tpu.memory_space<vmem>>, vector<1x16x16xf32>
    %30 = vector.shape_cast %29 : vector<1x16x16xf32> to vector<16x16xf32>
    %31 = arith.truncf %30 : vector<16x16xf32> to vector<16x16xbf16>
    %cst_12 = arith.constant dense<0.000000e+00> : vector<16x32xf32>
    %32 = tpu.matmul %31, %28, %cst_12 {dimension_numbers = #tpu.dot_dimension_numbers<[1], [0], [0], [1], [0, 0, 1, 1], [], []>} : vector<16x16xbf16>, vector<16x32xbf16>, vector<16x32xf32> -> vector<16x32xf32>
    %33 = vector.extract_strided_slice %5 {offsets = [2, 0], sizes = [1, 32], strides = [1, 1]} : vector<7x32xf32> to vector<1x32xf32>
    %34 = vector.broadcast %33 : vector<1x32xf32> to vector<16x32xf32>
    %35 = arith.mulf %34, %32 : vector<16x32xf32>
    %36 = arith.addf %3, %35 : vector<16x32xf32>
    %37 = vector.extract_strided_slice %5 {offsets = [3, 0], sizes = [1, 32], strides = [1, 1]} : vector<7x32xf32> to vector<1x32xf32>
    %38 = vector.extract_strided_slice %5 {offsets = [4, 0], sizes = [1, 32], strides = [1, 1]} : vector<7x32xf32> to vector<1x32xf32>
    %cst_13 = arith.constant dense<0.000000e+00> : vector<16xf32>
    %39 = vector.multi_reduction <add>, %36, %cst_13 [1] : vector<16x32xf32> to vector<16xf32>
    %40 = vector.shape_cast %39 : vector<16xf32> to vector<16x1xf32>
    %cst_14 = arith.constant 3.200000e+01 : f32
    %41 = vector.broadcast %cst_14 : f32 to vector<16x1xf32>
    %42 = arith.divf %40, %41 : vector<16x1xf32>
    %43 = vector.broadcast %42 : vector<16x1xf32> to vector<16x32xf32>
    %44 = arith.subf %36, %43 : vector<16x32xf32>
    %45 = arith.mulf %44, %44 : vector<16x32xf32>
    %cst_15 = arith.constant dense<0.000000e+00> : vector<16xf32>
    %46 = vector.multi_reduction <add>, %45, %cst_15 [1] : vector<16x32xf32> to vector<16xf32>
    %47 = vector.shape_cast %46 : vector<16xf32> to vector<16x1xf32>
    %cst_16 = arith.constant 3.200000e+01 : f32
    %48 = vector.broadcast %cst_16 : f32 to vector<16x1xf32>
    %49 = arith.divf %47, %48 : vector<16x1xf32>
    %cst_17 = arith.constant 9.99999997E-7 : f32
    %50 = vector.broadcast %cst_17 : f32 to vector<16x1xf32>
    %51 = arith.addf %49, %50 : vector<16x1xf32>
    %52 = math.rsqrt %51 : vector<16x1xf32>
    %53 = vector.broadcast %52 : vector<16x1xf32> to vector<16x32xf32>
    %54 = arith.mulf %44, %53 : vector<16x32xf32>
    %55 = vector.broadcast %37 : vector<1x32xf32> to vector<16x32xf32>
    %56 = arith.mulf %54, %55 : vector<16x32xf32>
    %57 = vector.broadcast %38 : vector<1x32xf32> to vector<16x32xf32>
    %58 = arith.addf %56, %57 : vector<16x32xf32>
    %59 = arith.truncf %58 : vector<16x32xf32> to vector<16x32xbf16>
    %c0_18 = arith.constant 0 : index
    %c0_19 = arith.constant 0 : index
    %c0_20 = arith.constant 0 : index
    %60 = vector.load %arg10[%c0_18, %c0_19, %c0_20] : memref<1x32x128xbf16, #tpu.memory_space<vmem>>, vector<1x32x128xbf16>
    %61 = vector.shape_cast %60 : vector<1x32x128xbf16> to vector<32x128xbf16>
    %cst_21 = arith.constant dense<0.000000e+00> : vector<16x128xf32>
    %62 = tpu.matmul %59, %61, %cst_21 {dimension_numbers = #tpu.dot_dimension_numbers<[1], [0], [0], [1], [0, 0, 1, 1], [], []>} : vector<16x32xbf16>, vector<32x128xbf16>, vector<16x128xf32> -> vector<16x128xf32>
    %c0_22 = arith.constant 0 : index
    %c0_23 = arith.constant 0 : index
    %c0_24 = arith.constant 0 : index
    %63 = vector.load %arg9[%c0_22, %c0_23, %c0_24] : memref<1x1x128xf32, #tpu.memory_space<vmem>>, vector<1x1x128xf32>
    %64 = vector.shape_cast %63 : vector<1x1x128xf32> to vector<1x128xf32>
    %65 = vector.broadcast %64 : vector<1x128xf32> to vector<16x128xf32>
    %66 = arith.addf %62, %65 : vector<16x128xf32>
    %cst_25 = arith.constant 5.000000e-01 : f32
    %67 = vector.broadcast %cst_25 : f32 to vector<16x128xf32>
    %68 = arith.mulf %67, %66 : vector<16x128xf32>
    %cst_26 = arith.constant 0.707106769 : f32
    %69 = vector.broadcast %cst_26 : f32 to vector<16x128xf32>
    %70 = arith.mulf %66, %69 : vector<16x128xf32>
    %71 = math.erf %70 : vector<16x128xf32>
    %cst_27 = arith.constant 1.000000e+00 : f32
    %72 = vector.broadcast %cst_27 : f32 to vector<16x128xf32>
    %73 = arith.addf %72, %71 : vector<16x128xf32>
    %74 = arith.mulf %68, %73 : vector<16x128xf32>
    %75 = arith.truncf %74 : vector<16x128xf32> to vector<16x128xbf16>
    %c0_28 = arith.constant 0 : index
    %c0_29 = arith.constant 0 : index
    %c0_30 = arith.constant 0 : index
    %76 = vector.load %arg11[%c0_28, %c0_29, %c0_30] : memref<1x128x32xbf16, #tpu.memory_space<vmem>>, vector<1x128x32xbf16>
    %77 = vector.shape_cast %76 : vector<1x128x32xbf16> to vector<128x32xbf16>
    %cst_31 = arith.constant dense<0.000000e+00> : vector<16x32xf32>
    %78 = tpu.matmul %75, %77, %cst_31 {dimension_numbers = #tpu.dot_dimension_numbers<[1], [0], [0], [1], [0, 0, 1, 1], [], []>} : vector<16x128xbf16>, vector<128x32xbf16>, vector<16x32xf32> -> vector<16x32xf32>
    %79 = vector.extract_strided_slice %5 {offsets = [6, 0], sizes = [1, 32], strides = [1, 1]} : vector<7x32xf32> to vector<1x32xf32>
    %80 = vector.broadcast %79 : vector<1x32xf32> to vector<16x32xf32>
    %81 = arith.addf %78, %80 : vector<16x32xf32>
    %82 = vector.extract_strided_slice %5 {offsets = [5, 0], sizes = [1, 32], strides = [1, 1]} : vector<7x32xf32> to vector<1x32xf32>
    %83 = vector.broadcast %82 : vector<1x32xf32> to vector<16x32xf32>
    %84 = arith.mulf %83, %81 : vector<16x32xf32>
    %85 = arith.addf %36, %84 : vector<16x32xf32>
    %c0_32 = arith.constant 0 : index
    %c0_33 = arith.constant 0 : index
    %86 = vector.load %arg16[%c0_32, %c0_33] : memref<16x32xf32, #tpu.memory_space<vmem>>, vector<16x32xf32>
    tpu.vector_store %arg16[%c0_32, %c0_33], %85 {strides = array<i32>} : memref<16x32xf32, #tpu.memory_space<vmem>>, vector<16x32xf32>,
    %c1_i32 = arith.constant 1 : i32
    %87 = arith.cmpi eq, %arg1, %c1_i32 : i32
    %88 = arith.extui %87 : i1 to i32
    %c0_i32_34 = arith.constant 0 : i32
    %89 = arith.cmpi ne, %88, %c0_i32_34 : i32
    scf.if %89 {
      %c0_35 = arith.constant 0 : index
      %c0_36 = arith.constant 0 : index
      %90 = vector.load %arg12[%c0_35, %c0_36] : memref<2x32xf32, #tpu.memory_space<vmem>>, vector<2x32xf32>
      %91 = vector.extract_strided_slice %90 {offsets = [0, 0], sizes = [1, 32], strides = [1, 1]} : vector<2x32xf32> to vector<1x32xf32>
      %92 = vector.extract_strided_slice %90 {offsets = [1, 0], sizes = [1, 32], strides = [1, 1]} : vector<2x32xf32> to vector<1x32xf32>
      %cst_37 = arith.constant dense<0.000000e+00> : vector<16xf32>
      %93 = vector.multi_reduction <add>, %85, %cst_37 [1] : vector<16x32xf32> to vector<16xf32>
      %94 = vector.shape_cast %93 : vector<16xf32> to vector<16x1xf32>
      %cst_38 = arith.constant 3.200000e+01 : f32
      %95 = vector.broadcast %cst_38 : f32 to vector<16x1xf32>
      %96 = arith.divf %94, %95 : vector<16x1xf32>
      %97 = vector.broadcast %96 : vector<16x1xf32> to vector<16x32xf32>
      %98 = arith.subf %85, %97 : vector<16x32xf32>
      %99 = arith.mulf %98, %98 : vector<16x32xf32>
      %cst_39 = arith.constant dense<0.000000e+00> : vector<16xf32>
      %100 = vector.multi_reduction <add>, %99, %cst_39 [1] : vector<16x32xf32> to vector<16xf32>
      %101 = vector.shape_cast %100 : vector<16xf32> to vector<16x1xf32>
      %cst_40 = arith.constant 3.200000e+01 : f32
      %102 = vector.broadcast %cst_40 : f32 to vector<16x1xf32>
      %103 = arith.divf %101, %102 : vector<16x1xf32>
      %cst_41 = arith.constant 9.99999997E-7 : f32
      %104 = vector.broadcast %cst_41 : f32 to vector<16x1xf32>
      %105 = arith.addf %103, %104 : vector<16x1xf32>
      %106 = math.rsqrt %105 : vector<16x1xf32>
      %107 = vector.broadcast %106 : vector<16x1xf32> to vector<16x32xf32>
      %108 = arith.mulf %98, %107 : vector<16x32xf32>
      %109 = vector.broadcast %91 : vector<1x32xf32> to vector<16x32xf32>
      %110 = arith.mulf %108, %109 : vector<16x32xf32>
      %111 = vector.broadcast %92 : vector<1x32xf32> to vector<16x32xf32>
      %112 = arith.addf %110, %111 : vector<16x32xf32>
      %c0_42 = arith.constant 0 : index
      %c0_43 = arith.constant 0 : index
      %113 = vector.load %arg6[%c0_42, %c0_43] : memref<1x16xf32, #tpu.memory_space<vmem>>, vector<1x16xf32>
      %cst_44 = arith.constant dense<0.000000e+00> : vector<1x32xf32>
      %114 = tpu.matmul %113, %112, %cst_44 {dimension_numbers = #tpu.dot_dimension_numbers<[1], [0], [0], [1], [0, 0, 1, 1], [], []>} : vector<1x16xf32>, vector<16x32xf32>, vector<1x32xf32> -> vector<1x32xf32>
      %115 = arith.truncf %114 : vector<1x32xf32> to vector<1x32xbf16>
      %c0_45 = arith.constant 0 : index
      %c0_46 = arith.constant 0 : index
      %116 = vector.load %arg13[%c0_45, %c0_46] : memref<32x10xbf16, #tpu.memory_space<vmem>>, vector<32x10xbf16>
      %cst_47 = arith.constant dense<0.000000e+00> : vector<1x10xf32>
      %117 = tpu.matmul %115, %116, %cst_47 {dimension_numbers = #tpu.dot_dimension_numbers<[1], [0], [0], [1], [0, 0, 1, 1], [], []>} : vector<1x32xbf16>, vector<32x10xbf16>, vector<1x10xf32> -> vector<1x10xf32>
      %c0_48 = arith.constant 0 : index
      %c0_49 = arith.constant 0 : index
      %118 = vector.load %arg14[%c0_48, %c0_49] : memref<1x10xf32, #tpu.memory_space<vmem>>, vector<1x10xf32>
      %119 = arith.addf %117, %118 : vector<1x10xf32>
      %c0_50 = arith.constant 0 : index
      %c0_51 = arith.constant 0 : index
      %c0_52 = arith.constant 0 : index
      %120 = vector.load %arg15[%c0_50, %c0_51, %c0_52] : memref<1x1x10xf32, #tpu.memory_space<vmem>>, vector<1x1x10xf32>
      %121 = vector.shape_cast %120 : vector<1x1x10xf32> to vector<1x10xf32>
      %122 = vector.shape_cast %119 : vector<1x10xf32> to vector<1x1x10xf32>
      tpu.vector_store %arg15[%c0_50, %c0_51, %c0_52], %122 {strides = array<i32>} : memref<1x1x10xf32, #tpu.memory_space<vmem>>, vector<1x1x10xf32>,
    } else {
    }
    return
  }
  func.func @transform_0(%arg0: i32, %arg1: i32) -> (i32, i32, i32) {
    %c0_i32 = arith.constant 0 : i32
    %c0_i32_0 = arith.constant 0 : i32
    %c0_i32_1 = arith.constant 0 : i32
    return %arg0, %c0_i32, %c0_i32_0 : i32, i32, i32
  }
  func.func @transform_1(%arg0: i32, %arg1: i32) -> (i32, i32) {
    %c0_i32 = arith.constant 0 : i32
    %c0_i32_0 = arith.constant 0 : i32
    %c0_i32_1 = arith.constant 0 : i32
    return %c0_i32, %c0_i32_0 : i32, i32
  }
  func.func @transform_2(%arg0: i32, %arg1: i32) -> (i32, i32) {
    %c0_i32 = arith.constant 0 : i32
    %c0_i32_0 = arith.constant 0 : i32
    %c0_i32_1 = arith.constant 0 : i32
    return %c0_i32, %c0_i32_0 : i32, i32
  }
  func.func @transform_3(%arg0: i32, %arg1: i32) -> (i32, i32) {
    %c0_i32 = arith.constant 0 : i32
    %c0_i32_0 = arith.constant 0 : i32
    %c0_i32_1 = arith.constant 0 : i32
    return %c0_i32, %c0_i32_0 : i32, i32
  }
  func.func @transform_4(%arg0: i32, %arg1: i32) -> (i32, i32) {
    %c0_i32 = arith.constant 0 : i32
    %c0_i32_0 = arith.constant 0 : i32
    %c0_i32_1 = arith.constant 0 : i32
    return %c0_i32, %c0_i32_0 : i32, i32
  }
  func.func @transform_5(%arg0: i32, %arg1: i32) -> (i32, i32, i32) {
    %c0_i32 = arith.constant 0 : i32
    %c0_i32_0 = arith.constant 0 : i32
    %c0_i32_1 = arith.constant 0 : i32
    return %arg1, %c0_i32, %c0_i32_0 : i32, i32, i32
  }
  func.func @transform_6(%arg0: i32, %arg1: i32) -> (i32, i32, i32) {
    %c0_i32 = arith.constant 0 : i32
    %c0_i32_0 = arith.constant 0 : i32
    %c0_i32_1 = arith.constant 0 : i32
    return %arg1, %c0_i32, %c0_i32_0 : i32, i32, i32
  }
  func.func @transform_7(%arg0: i32, %arg1: i32) -> (i32, i32, i32) {
    %c0_i32 = arith.constant 0 : i32
    %c0_i32_0 = arith.constant 0 : i32
    %c0_i32_1 = arith.constant 0 : i32
    return %arg1, %c0_i32, %c0_i32_0 : i32, i32, i32
  }
  func.func @transform_8(%arg0: i32, %arg1: i32) -> (i32, i32, i32) {
    %c0_i32 = arith.constant 0 : i32
    %c0_i32_0 = arith.constant 0 : i32
    %c0_i32_1 = arith.constant 0 : i32
    return %arg1, %c0_i32, %c0_i32_0 : i32, i32, i32
  }
  func.func @transform_9(%arg0: i32, %arg1: i32) -> (i32, i32, i32) {
    %c0_i32 = arith.constant 0 : i32
    %c0_i32_0 = arith.constant 0 : i32
    %c0_i32_1 = arith.constant 0 : i32
    return %arg1, %c0_i32, %c0_i32_0 : i32, i32, i32
  }
  func.func @transform_10(%arg0: i32, %arg1: i32) -> (i32, i32) {
    %c0_i32 = arith.constant 0 : i32
    %c0_i32_0 = arith.constant 0 : i32
    %c0_i32_1 = arith.constant 0 : i32
    return %c0_i32, %c0_i32_0 : i32, i32
  }
  func.func @transform_11(%arg0: i32, %arg1: i32) -> (i32, i32) {
    %c0_i32 = arith.constant 0 : i32
    %c0_i32_0 = arith.constant 0 : i32
    %c0_i32_1 = arith.constant 0 : i32
    return %c0_i32, %c0_i32_0 : i32, i32
  }
  func.func @transform_12(%arg0: i32, %arg1: i32) -> (i32, i32) {
    %c0_i32 = arith.constant 0 : i32
    %c0_i32_0 = arith.constant 0 : i32
    %c0_i32_1 = arith.constant 0 : i32
    return %c0_i32, %c0_i32_0 : i32, i32
  }
  func.func @transform_13(%arg0: i32, %arg1: i32) -> (i32, i32, i32) {
    %c0_i32 = arith.constant 0 : i32
    %c0_i32_0 = arith.constant 0 : i32
    %c0_i32_1 = arith.constant 0 : i32
    return %arg0, %c0_i32, %c0_i32_0 : i32, i32, i32
  }
}

</mosaic_0001>

<bundles_post_ra>
// kernel: pure_mlp_forward.1
= control target key start
LH: loop header
LB: loop body
LE: loop exit
PB: predicated region body
PF: predicated region fallthrough
CT: control target
= control target key end

     0   :  { %s2153_s0 = inlined_call_operand.vmem [shape: f32[2,16,192], index: 0, kind: input, shape index: {}]   ;;  %s2154_s1 = inlined_call_operand.vmem [shape: bf16[192,32], index: 1, kind: input, shape index: {}]   ;;  %s2155_s2 = inlined_call_operand.vmem [shape: f32[3,32], index: 2, kind: input, shape index: {}]   ;;  %s2156_s3 = inlined_call_operand.vmem [shape: f32[16,32], index: 3, kind: input, shape index: {}]   ;;  %s2157_s4 = inlined_call_operand.vmem [shape: f32[1,16], index: 4, kind: input, shape index: {}]   ;;  %s2158_s5 = inlined_call_operand.vmem [shape: f32[2,16,16], index: 5, kind: input, shape index: {}]   ;;  %s2159_s6 = inlined_call_operand.vmem [shape: f32[2,7,32], index: 6, kind: input, shape index: {}]   ;;  %s2160_s7 = inlined_call_operand.vmem [shape: f32[2,1,128], index: 7, kind: input, shape index: {}]   ;;  %s2161_s8 = inlined_call_operand.vmem [shape: bf16[2,32,128], index: 8, kind: input, shape index: {}]   ;;  %s2162_s9 = inlined_call_operand.vmem [shape: bf16[2,128,32], index: 9, kind: input, shape index: {}]   ;;  %s2163_s10 = inlined_call_operand.vmem [shape: f32[2,32], index: 10, kind: input, shape index: {}]   ;;  %s2164_s11 = inlined_call_operand.vmem [shape: bf16[32,10], index: 11, kind: input, shape index: {}]   ;;  %s2165_s12 = inlined_call_operand.vmem [shape: f32[1,10], index: 12, kind: input, shape index: {}]   ;;  %s2166_s13 = inlined_call_operand.hbm [shape: f32[2,1,10], index: 13, kind: output, shape index: {}]  }
   0x1   :  { %2179 = sst [smem:[#allocation17_spill]] %s2153_s0 }
   0x2   :  { %2180 = sst [smem:[#allocation18_spill]] %s2157_s4 }
   0x3   :  { %2181 = sst [smem:[#allocation19_spill]] %s2158_s5 }
   0x4   :  { %2182 = sst [smem:[#allocation20_spill]] %s2165_s12 }
   0x5   :  { %2183 = sst [smem:[#allocation21_spill]] %s2166_s13 }
   0x6   :  { %18 = vsyncpa [#allocation4], 0 }
   0x7   :  { %20 = vsyncpa [#allocation4 + $0x1], 0  ;;  %s1815_s25 = smov 0   ;;  %s1817_s26 = smov 0  }
   0x8   :  { %s1819_s27 = smov 0   ;;  %s1821_s28 = smov 0  }
   0x9   :  { %s1823_s29 = smov 0   ;;  %s1825_s30 = smov 0  }
   0xa   :  { %s1827_s14 = smov 0   ;;  %s1829_s15 = smov 0  }
   0xb LB: > { %2184 = sst [smem:[#allocation6_spill]] %s1708_s25  ;;  %s1396_s16 = sadd.s32 4294967295, %s1736_s15   ;;  %s1736_s15 = sphi %s1829_s15, %s26_s15   ;;  %s1732_s14 = sphi %s1827_s14, %s2214_s14   ;;  %s1728_s30 = sphi %s1825_s30, %s2213_s30   ;;  %s1724_s29 = sphi %s1823_s29, %s2218_s29   ;;  %s1720_s28 = sphi %s1821_s28, %s2217_s28   ;;  %s1716_s27 = sphi %s1819_s27, %s2210_s27   ;;  %s1712_s26 = sphi %s1817_s26, %s2216_s26   ;;  %s1708_s25 = sphi %s1815_s25, %s2215_s25  }
   0xc   : > { %2185 = sst [smem:[#allocation7_spill]] %s1716_s27  ;;  %s1397_s17 = sadd.s32 4294967294, %s1736_s15  }
   0xd   : > { %2186 = sst [smem:[#allocation8_spill]] %s1724_s29  ;;  %s35_s18 = sadd.s32 1, %s1728_s30 }
   0xe   : > { %2187 = sst [smem:[#allocation9_spill]] %s1728_s30  ;;  %p36_p0 = scmp.ge.s32.totalorder %s35_s18, 2 }
   0xf   : > { %2188 = sst [smem:[#allocation10_spill]] %s1732_s14  ;;  %s38_s19 = sadd.s32 1, %s1732_s14 }
  0x10   : > { %2189 = sst [smem:[#allocation11_spill]] %s1736_s15  ;;  %p358_p1 = scmp.ne.s32.totalorder %s1716_s27, %s1712_s26 }
  0x11   : > { %p359_p2 = scmp.eq.s32.totalorder %s1396_s16, 3  ;;  %s2220_s18 = smov (%p36_p0, %s35_s18), 0 }
  0x12   : > { %2190 = sst [smem:[#allocation12_spill]] %s2220_s18  ;;  %s2222_s19 = smov (!%p36_p0, %s38_s19), %s1732_s14 }
  0x13   : > { %p1864_p3 = por %p359_p2, %p358_p1  ;;  %p364_p4 = scmp.ne.s32.totalorder %s1712_s26, %s1708_s25 }
  0x14   : > { %p40_p5 = scmp.ge.s32.totalorder %s2222_s19, 2  ;;  %p365_p6 = scmp.eq.s32.totalorder %s1397_s17, 3 }
  0x15   : > { %s2191_s20 = scalar_select %p1864_p3, 1, 0 }
  0x16   : > { %p1400_p7 = scmp.ge.s32.totalorder %s1736_s15, 1  ;;  %p449_p8 = scmp.lt.s32.totalorder %s1736_s15, 5 }
  0x17   : > { %2192 = sst [smem:[#allocation13_spill]] %s2191_s20  ;;  %s2224_s19 = smov (%p40_p5, %s2222_s19), 0 }
  0x18   : > { %2193 = sst [smem:[#allocation14_spill]] %s2224_s19  ;;  %p1874_p9 = por %p365_p6, %p364_p4 }
  0x19   : > { %p450_p10 = pnand %p1400_p7, %p449_p8  ;;  %s345_s22 = ssub.s32 %s1732_s14, %s2224_s19 }
  0x1a   : > { %s2194_s21 = scalar_select %p1874_p9, 1, 0 }
  0x1b   : > { %s348_s23 = sadd.s32 1, %s1716_s27  ;;  %p346_p11 = scmp.eq.s32.totalorder %s345_s22, 0 }
  0x1c   : > { %2195 = sst [smem:[#allocation15_spill]] %s2194_s21  ;;  %453 = sbr.rel (%p450_p10) target bundleno = 2709 (0xa95), region = 72 }
  0x1d   : > { %s1882_s24 = scalar_select %p346_p11, %s1716_s27, %s348_s23  }
  0x1e   : > { %p514_p12 = scmp.lt.s32.totalorder (!%p450_p10), %s1724_s29, 1  ;;  %p519_p13 = scmp.lt.s32.totalorder (!%p450_p10), %s1720_s28, 1 }
  0x1f   : > { %2196 = sst [smem:[#allocation16_spill]] %s1882_s24  ;;  %s2197_s0 = sld [smem:[#allocation17_spill]] (!%p450_p10) }
  0x20   : > { %s2198_s5 = sld [smem:[#allocation19_spill]] (!%p450_p10)  ;;  %p1410_p0 = scmp.ne.s32.totalorder (!%p450_p10), %s1720_s28, 0 }
  0x23   : > { %s515_s17 = scalar_select %p514_p12, %s1724_s29, 1 }
  0x24   : > { %s1889_s18 = scalar_select %p519_p13, %s1720_s28, 1 }
  0x25   : > { %s1445_s22 = sshll.u32 %s515_s17, 5  ;;  %545 = sbr.rel (%p1410_p0) target bundleno = 620 (0x26c), region = 76  ;;  %v1598_v0 = vld [vmem:[%s2154_s1] sm:$0xff] (!%p1410_p0)   ;;  %v1738_v1 = vmov (!%p1410_p0), 0   ;;  %v1599_v2 = vld [vmem:[%s2154_s1 + $0x8] sm:$0xff] (!%p1410_p0)   ;;  %v1600_v3 = vld [vmem:[%s2154_s1 + $0x10] sm:$0xff] (!%p1410_p0)   ;;  %v577_v19 = vlaneseq (!%p1410_p0) }
  0x26   : > { %s1894_s14 = scalar_lea.vmem %s2197_s0, %s1445_s22  ;;  %s1446_s30 = sshll.u32 %s1889_s18, 4  ;;  %657 = vmatprep.subr.bf16.mxu0 (!%p1410_p0), %v1738_v1  ;;  %v1601_v4 = vld [vmem:[%s2154_s1 + $0x18] sm:$0xff] (!%p1410_p0)   ;;  %vm653_vm0 = vcmask (!%p1410_p0), 523264   ;;  %v1602_v8 = vld [vmem:[%s2154_s1 + $0x20] sm:$0xff] (!%p1410_p0)   ;;  %v1603_v9 = vld [vmem:[%s2154_s1 + $0x28] sm:$0xff] (!%p1410_p0)   ;;  %vm698_vm1 = vcmask (!%p1410_p0), 261120  }
  0x27   : > { %s1900_s16 = scalar_lea.vmem %s2198_s5, %s1446_s30  ;;  %s1405_s21 = sshll.u32 %s1889_s18, 3  ;;  %658 = vmatpush1.bf16.msra.mxu0 (!%p1410_p0), %v1598_v0  ;;  %v547_v5 = vld [vmem:[%s1894_s14 + $0x8] sm:$0xff] (!%p1410_p0)  ;;  %v549_v6 = vld [vmem:[%s1894_s14 + $0x18] sm:$0xff] (!%p1410_p0)  ;;  %v1604_v10 = vld [vmem:[%s2154_s1 + $0x30] sm:$0xff] (!%p1410_p0)   ;;  %v578_v20 = vshrl.u32 (!%p1410_p0), %v577_v19, 7 }
  0x28   : > { %s1906_s13 = scalar_lea.vmem %s2159_s6, %s1405_s21  ;;  %s530_s17 = scalar_lea.vmem %s2160_s7, %s1889_s18  ;;  %659 = vmatprep.subr.bf16.mxu0 (!%p1410_p0), %v1738_v1  ;;  %v551_v7 = vpack.c.bf16 (!%p1410_p0), %v549_v6, %v547_v5  ;;  %v1605_v11 = vld [vmem:[%s2154_s1 + $0x38] sm:$0xff] (!%p1410_p0)   ;;  %v1606_v12 = vld [vmem:[%s2154_s1 + $0x40] sm:$0xff] (!%p1410_p0)   ;;  %v1607_v13 = vld [vmem:[%s2154_s1 + $0x48] sm:$0xff] (!%p1410_p0)  }
  0x29   : > { %s1915_s22 = scalar_lea.vmem %s2161_s8, %s1446_s30  ;;  %s1448_s23 = sshll.u32 %s1889_s18, 6  ;;  %v1608_v14 = vld [vmem:[%s2154_s1 + $0x50] sm:$0xff] (!%p1410_p0)   ;;  %v1609_v15 = vld [vmem:[%s2154_s1 + $0x58] sm:$0xff] (!%p1410_p0)   ;;  %v546_v16 = vld [vmem:[%s1894_s14] sm:$0xff] (!%p1410_p0)  ;;  %v579_v21 = vsub.s32 (!%p1410_p0), 0, %v578_v20  ;;  %v728_v48 = vsub.s32 (!%p1410_p0), 1, %v578_v20 }
  0x2a   : > { %s1921_s24 = scalar_lea.vmem %s2162_s9, %s1448_s23  ;;  %s2199_s5 = sand.u32 1, %s1712_s26   ;;  %1423 = vmatprep.mubr.msk.bf16.mxu0 (!%p1410_p0), %vm653_vm0, %v551_v7  ;;  %v548_v17 = vld [vmem:[%s1894_s14 + $0x10] sm:$0xff] (!%p1410_p0)  ;;  %v552_v22 = vld [vmem:[%s2155_s2] sm:$0x7] (!%p1410_p0)  ;;  %v734_v49 = vsub.s32 (!%p1410_p0), 2, %v578_v20  ;;  %v739_v61 = vld [vmem:[%s2156_s3 + $0x8] sm:$0xff] (!%p1410_p0) }
  0x2b   : > { %s1925_s4 = scalar_lea.vmem [#allocation3], %s2199_s5  ;;  %660 = vmatpush1.bf16.msra.mxu0 (!%p1410_p0), %v1599_v2  ;;  %v550_v18 = vpack.c.bf16 (!%p1410_p0), %v548_v17, %v546_v16  ;;  %v580_v23 = vrot.slane (!%p1410_p0), %v552_v22, %v579_v21  ;;  %v729_v50 = vrot.slane (!%p1410_p0), %v552_v22, %v728_v48  ;;  %v738_v56 = vld [vmem:[%s2156_s3] sm:$0xff] (!%p1410_p0) }
  0x2c   : > { %661 = vmatprep.subr.bf16.mxu0 %v1738_v1  ;;  %v735_v52 = vrot.slane %v552_v22, %v734_v49 }
  0x2f   : > { %662 = vmatpush1.bf16.msra.mxu0 %v1600_v3 }
  0x30   : > { %663 = vmatprep.subr.bf16.mxu0 %v1738_v1 }
  0x33   : > { %664 = vmatpush1.bf16.msra.mxu0 %v1601_v4 }
  0x34   : > { %665 = vmatprep.subr.bf16.mxu0 %v1738_v1 }
  0x37   : > { %666 = vmatpush1.bf16.msra.mxu0 %v1602_v8 }
  0x38   : > { %667 = vmatprep.subr.bf16.mxu0 %v1738_v1 }
  0x3b   : > { %668 = vmatpush1.bf16.msra.mxu0 %v1603_v9 }
  0x3c   : > { %669 = vmatprep.subr.bf16.mxu0 %v1738_v1 }
  0x3f   : > { %670 = vmatpush1.bf16.msra.mxu0 %v1604_v10 }
  0x40   : > { %671 = vmatprep.subr.bf16.mxu0 %v1738_v1 }
  0x43   : > { %672 = vmatpush1.bf16.msra.mxu0 %v1605_v11 }
  0x44   : > { %673 = vmatprep.subr.bf16.mxu0 %v1738_v1 }
  0x47   : > { %674 = vmatpush1.bf16.msra.mxu0 %v1606_v12 }
  0x48   : > { %675 = vmatprep.subr.bf16.mxu0 %v1738_v1 }
  0x4b   : > { %676 = vmatpush1.bf16.msra.mxu0 %v1607_v13 }
  0x4c   : > { %677 = vmatprep.subr.bf16.mxu0 %v1738_v1 }
  0x4f   : > { %678 = vmatpush1.bf16.msra.mxu0 %v1608_v14 }
  0x50   : > { %679 = vmatprep.subr.bf16.mxu0 %v1738_v1 }
  0x53   : > { %680 = vmatpush1.bf16.msra.mxu0 %v1609_v15 }
  0x56   : > { %690 = vmatmul.mubr.bf16.vlgmr.msra.gmra.mrb[0].mxu0 %v550_v18 }
 0x129   : > { %v691_v24 = vpop.f32.mrb[0].mxu0 }
 0x12a   : > { %v692_v25 = vadd.f32 %v691_v24, %v580_v23  ;;  %v693_v26 = vpop.f32.mrb[1].mxu0 }
 0x12b   : > { %v694_v27 = vpop.f32.mrb[2].mxu0 }
 0x12c   : > { %v695_v28 = vadd.f32 %v694_v27, %v580_v23  ;;  %v696_v29 = vpop.f32.mrb[3].mxu0  ;;  %v699_v30 = vsel %vm698_vm1, %v692_v25, 0.0 }
 0x12d   : > { %700 = vadd.xlane.f32.xlu0 %v699_v30 }
 0x12e   : > { %v702_v31 = vsel %vm698_vm1, %v695_v28, 0.0 }
 0x131   : > { %703 = vadd.xlane.f32.xlu0 %v702_v31 }
 0x1ba   : > { %v701_v32 = vpop.xlane.xlu0 %700 }
 0x1bb   : > { %v706_v33 = vmul.f32 0.03125, %v701_v32 }
 0x1bd   : > { %v708_v34 = vsub.f32 %v692_v25, %v706_v33 }
 0x1be   : > { %v704_v35 = vpop.xlane.xlu0 %703 }
 0x1bf   : > { %v707_v36 = vmul.f32 0.03125, %v704_v35  ;;  %v710_v37 = vmul.f32 %v708_v34, %v708_v34 }
 0x1c1   : > { %v709_v38 = vsub.f32 %v695_v28, %v707_v36  ;;  %v712_v39 = vsel %vm698_vm1, %v710_v37, 0.0 }
 0x1c2   : > { %713 = vadd.xlane.f32.xlu1 %v712_v39 }
 0x1c3   : > { %v711_v40 = vmul.f32 %v709_v38, %v709_v38 }
 0x1c5   : > { %v715_v41 = vsel %vm698_vm1, %v711_v40, 0.0 }
 0x1c6   : > { %716 = vadd.xlane.f32.xlu1 %v715_v41 }
 0x24f   : > { %v714_v42 = vpop.xlane.xlu1 %713 }
 0x250   : > { %v718_v43 = vmul.f32 0.03125, %v714_v42 }
 0x252   : > { %v720_v44 = vadd.f32 1e-06, %v718_v43 }
 0x253   : > { %v717_v45 = vpop.xlane.xlu1 %716 }
 0x254   : > { %1610 = vrsqrt.f32 %v720_v44  ;;  %v719_v46 = vmul.f32 0.03125, %v717_v45 }
 0x256   : > { %v721_v47 = vadd.f32 1e-06, %v719_v46 }
 0x258   : > { %1612 = vrsqrt.f32 %v721_v47 }
 0x25e   : > { %v1611_v51 = vpop.eup %1610 }
 0x25f   : > { %v724_v53 = vmul.f32 %v1611_v51, %v708_v34 }
 0x261   : > { %v730_v54 = vmul.f32 %v729_v50, %v724_v53 }
 0x262   : > { %v1613_v55 = vpop.eup %1612 }
 0x263   : > { %v736_v57 = vadd.f32 %v735_v52, %v730_v54  ;;  %v725_v58 = vmul.f32 %v1613_v55, %v709_v38 }
 0x265   : > { %v740_v59 = vadd.f32 %v738_v56, %v736_v57  ;;  %v731_v60 = vmul.f32 %v729_v50, %v725_v58 }
 0x267   : > { %742 = vst.msk [vmem:[#allocation2] sm:$0xff] %vm698_vm1, %v740_v59  ;;  %v737_v62 = vadd.f32 %v735_v52, %v731_v60 }
 0x269   : > { %v741_v63 = vadd.f32 %v739_v61, %v737_v62 }
 0x26b   : > { %743 = vst.msk [vmem:[#allocation2 + $0x8] sm:$0xff] %vm698_vm1, %v741_v63 }
 0x26c PF: > { %vm747_vm2 = vcmask 261120   ;;  %v1739_v14 = vmov 0.0   ;;  %vm1740_vm3 = vmmov 0   ;;  %v775_v19 = vlaneseq  ;;  %v2005_v24 = vld [vmem:[%s1906_s13] sm:$0x7f]  ;;  %v789_v37 = vld [vmem:[%s1900_s16 + $0x8] sm:$0xff] }
 0x26d   : > { %1469 = vmatprep.subr.bf16.mxu1 %v1739_v14  ;;  %1483 = vmatprep.subr.bf16.mxu0 %v1739_v14  ;;  %v788_v36 = vld [vmem:[%s1900_s16] sm:$0xff]  ;;  %vm791_vm4 = vcmask 130048   ;;  %v1615_v63 = vld [vmem:[%s1915_s22 + $0x8] sm:$0xff]   ;;  %p1437_p1 = scmp.ne.s32.totalorder %s1720_s28, 1 }
 0x26e   : > { %v1983_v0 = vld [vmem:[#allocation2] sm:$0xff]  ;;  %1471 = vmatprep.mubr.msk.bf16.mxu1 %vm1740_vm3, %v1739_v14  ;;  %1499 = vmatprep.mubr.msk.bf16.mxu0 %vm1740_vm3, %v1739_v14  ;;  %v2001_v22 = vshrl.u32 %v775_v19, 7  ;;  %v790_v39 = vpack.c.bf16 %v789_v37, %v788_v36  ;;  %vm1742_vm5 = vmmov (!%p1437_p1), 0   ;;  %s2200_s15 = sld [smem:[#allocation18_spill]] (!%p1437_p1)  ;;  %s2201_s27 = sld [smem:[#allocation20_spill]] (!%p1437_p1)  ;;  %vm1258_vm6 = vcmask (!%p1437_p1), 73728  }
 0x26f   : > { %v748_v2 = vsel %vm747_vm2, %v1983_v0, 0.0  ;;  %v1614_v62 = vld [vmem:[%s1915_s22] sm:$0xff]  }
 0x270   : > { %749 = vadd.xlane.f32.xlu0 %v748_v2  ;;  %v777_v23 = vsub.s32 0, %v2001_v22  ;;  %v783_v28 = vsub.s32 1, %v2001_v22  ;;  %v838_v40 = vsub.s32 2, %v2001_v22 }
 0x272   : > { %v1985_v1 = vld [vmem:[#allocation2 + $0x8] sm:$0xff]  ;;  %v778_v27 = vrot.slane %v2005_v24, %v777_v23  ;;  %v784_v32 = vrot.slane %v2005_v24, %v783_v28  ;;  %v839_v41 = vrot.slane %v2005_v24, %v838_v40 }
 0x273   : > { %v751_v3 = vsel %vm747_vm2, %v1985_v1, 0.0 }
 0x274   : > { %752 = vadd.xlane.f32.xlu0 %v751_v3 }
 0x2fd   : > { %v750_v4 = vpop.xlane.xlu0 %749 }
 0x2fe   : > { %v755_v5 = vmul.f32 0.03125, %v750_v4 }
 0x300   : > { %v757_v6 = vsub.f32 %v1983_v0, %v755_v5 }
 0x301   : > { %v753_v7 = vpop.xlane.xlu0 %752 }
 0x302   : > { %v756_v8 = vmul.f32 0.03125, %v753_v7  ;;  %v759_v9 = vmul.f32 %v757_v6, %v757_v6 }
 0x304   : > { %v758_v10 = vsub.f32 %v1985_v1, %v756_v8  ;;  %v761_v11 = vsel %vm747_vm2, %v759_v9, 0.0  ;;  %v872_v8 = vsub.s32 3, %v2001_v22 }
 0x305   : > { %762 = vadd.xlane.f32.xlu1 %v761_v11 }
 0x306   : > { %v760_v12 = vmul.f32 %v758_v10, %v758_v10  ;;  %v873_v9 = vrot.slane %v2005_v24, %v872_v8 }
 0x308   : > { %v764_v13 = vsel %vm747_vm2, %v760_v12, 0.0 }
 0x309   : > { %765 = vadd.xlane.f32.xlu1 %v764_v13 }
 0x392   : > { %v763_v15 = vpop.xlane.xlu1 %762 }
 0x393   : > { %v767_v16 = vmul.f32 0.03125, %v763_v15 }
 0x395   : > { %v769_v17 = vadd.f32 1e-06, %v767_v16 }
 0x396   : > { %v766_v18 = vpop.xlane.xlu1 %765 }
 0x397   : > { %1624 = vrsqrt.f32 %v769_v17  ;;  %v768_v20 = vmul.f32 0.03125, %v766_v18 }
 0x399   : > { %v770_v21 = vadd.f32 1e-06, %v768_v20 }
 0x39b   : > { %1626 = vrsqrt.f32 %v770_v21 }
 0x3a1   : > { %v1625_v25 = vpop.eup %1624 }
 0x3a2   : > { %v773_v26 = vmul.f32 %v1625_v25, %v757_v6  ;;  %v1618_v25 = vld [vmem:[%s1921_s24 + $0x10] sm:$0xff]  }
 0x3a4   : > { %v779_v31 = vmul.f32 %v778_v27, %v773_v26  ;;  %v1619_v26 = vld [vmem:[%s1921_s24 + $0x18] sm:$0xff]  }
 0x3a5   : > { %v1627_v29 = vpop.eup %1626 }
 0x3a6   : > { %v774_v30 = vmul.f32 %v1627_v29, %v758_v10  ;;  %v785_v34 = vadd.f32 %v784_v32, %v779_v31  ;;  %v878_v10 = vsub.s32 4, %v2001_v22  ;;  %v1621_v29 = vld [vmem:[%s1921_s24 + $0x28] sm:$0xff]   ;;  %v1623_v31 = vld [vmem:[%s1921_s24 + $0x38] sm:$0xff]  }
 0x3a8   : > { %v780_v33 = vmul.f32 %v778_v27, %v774_v30  ;;  %v879_v17 = vrot.slane %v2005_v24, %v878_v10  ;;  %v1620_v27 = vld [vmem:[%s1921_s24 + $0x20] sm:$0xff]   ;;  %v1622_v30 = vld [vmem:[%s1921_s24 + $0x30] sm:$0xff]   ;;  %v1741_v10 = vmov (!%p1437_p1), 0.0|0.0  }
 0x3aa   : > { %v786_v35 = vadd.f32 %v784_v32, %v780_v33  ;;  %v1425_v32 = vld [vmem:[%s530_s17] ss:$0 sm:$0xff] }
 0x3ac   : > { %v787_v38 = vpack.c.bf16 %v786_v35, %v785_v34 }
 0x3ae   : > { %1470 = vmatpush3.bf16.msra.mxu1 %v787_v38 }
 0x3af   : > { %1475 = vmatprep.subr.bf16.mxu1 %v1739_v14 }
 0x3b1   : > { %1472 = vmatmul.mubr.msk.bf16.vlgmr.msra.gmra.mrb[0].mxu1 %vm791_vm4, %v790_v39 }
 0x3b2   : > { %1479 = vmatprep.mubr.msk.bf16.mxu1 %vm1740_vm3, %v1739_v14  ;;  %1476 = vmatpush3.bf16.msra.mxu1 %v1614_v62 }
 0x3b3   : > { %1477 = vmatprep.subr.bf16.mxu1 %v1739_v14 }
 0x3b6   : > { %1478 = vmatpush3.bf16.msra.mxu1 %v1615_v63 }
 0x484   : > { %v829_v42 = vpop.f32.mrb[0].mxu1 }
 0x485   : > { %v840_v43 = vmul.f32 %v839_v41, %v829_v42  ;;  %v1473_v44 = vpop.f32.mrb[1].mxu1 }
 0x486   : > { %v832_v45 = vpop.f32.mrb[2].mxu1 }
 0x487   : > { %v2023_v46 = vadd.f32 %v840_v43, %v1983_v0  ;;  %v841_v47 = vmul.f32 %v839_v41, %v832_v45  ;;  %v1474_v48 = vpop.f32.mrb[3].mxu1  ;;  %v1616_v0 = vld [vmem:[%s1921_s24] sm:$0xff]  }
 0x488   : > { %1484 = vmatpush3.bf16.msra.mxu0 %v1616_v0 }
 0x489   : > { %v2026_v49 = vadd.f32 %v841_v47, %v1985_v1  ;;  %v844_v50 = vsel %vm747_vm2, %v2023_v46, 0.0  ;;  %v1617_v1 = vld [vmem:[%s1921_s24 + $0x8] sm:$0xff]   ;;  %1485 = vmatprep.subr.bf16.mxu0 %v1739_v14 }
 0x48a   : > { %845 = vadd.xlane.f32.xlu0 %v844_v50 }
 0x48b   : > { %v847_v51 = vsel %vm747_vm2, %v2026_v49, 0.0 }
 0x48c   : > { %848 = vadd.xlane.f32.xlu1 %v847_v51  ;;  %1486 = vmatpush3.bf16.msra.mxu0 %v1617_v1  ;;  %v979_v51 = vsub.s32 6, %v2001_v22 }
 0x48d   : > { %1487 = vmatprep.subr.bf16.mxu0 %v1739_v14 }
 0x490   : > { %1488 = vmatpush3.bf16.msra.mxu0 %v1618_v25 }
 0x491   : > { %1489 = vmatprep.subr.bf16.mxu0 %v1739_v14 }
 0x494   : > { %1490 = vmatpush3.bf16.msra.mxu0 %v1619_v26 }
 0x495   : > { %1491 = vmatprep.subr.bf16.mxu0 %v1739_v14 }
 0x498   : > { %1492 = vmatpush3.bf16.msra.mxu0 %v1620_v27 }
 0x499   : > { %1493 = vmatprep.subr.bf16.mxu0 %v1739_v14 }
 0x49c   : > { %1494 = vmatpush3.bf16.msra.mxu0 %v1621_v29 }
 0x49d   : > { %1495 = vmatprep.subr.bf16.mxu0 %v1739_v14 }
 0x4a0   : > { %1496 = vmatpush3.bf16.msra.mxu0 %v1622_v30 }
 0x4a1   : > { %1497 = vmatprep.subr.bf16.mxu0 %v1739_v14 }
 0x4a4   : > { %1498 = vmatpush3.bf16.msra.mxu0 %v1623_v31 }
 0x4a5   : > { %1518 = vmatprep.subr.bf16.mxu0 (!%p1437_p1), %v1741_v10 }
 0x517   : > { %v846_v52 = vpop.xlane.xlu0 %845 }
 0x518   : > { %v850_v53 = vmul.f32 0.03125, %v846_v52  ;;  %v1072_v52 = vsub.s32 5, %v2001_v22 }
 0x519   : > { %v849_v54 = vpop.xlane.xlu1 %848 }
 0x51a   : > { %v852_v55 = vsub.f32 %v2023_v46, %v850_v53  ;;  %v851_v56 = vmul.f32 0.03125, %v849_v54  ;;  %v980_v53 = vrot.slane %v2005_v24, %v979_v51  ;;  %v1073_v54 = vrot.slane %v2005_v24, %v1072_v52 }
 0x51c   : > { %v853_v57 = vsub.f32 %v2026_v49, %v851_v56  ;;  %v854_v58 = vmul.f32 %v852_v55, %v852_v55 }
 0x51e   : > { %v856_v59 = vsel %vm747_vm2, %v854_v58, 0.0  ;;  %v855_v60 = vmul.f32 %v853_v57, %v853_v57 }
 0x51f   : > { %857 = vadd.xlane.f32.xlu0 %v856_v59 }
 0x520   : > { %v859_v61 = vsel %vm747_vm2, %v855_v60, 0.0 }
 0x521   : > { %860 = vadd.xlane.f32.xlu1 %v859_v61 }
 0x5ac   : > { %v858_v2 = vpop.xlane.xlu0 %857 }
 0x5ad   : > { %v862_v3 = vmul.f32 0.03125, %v858_v2 }
 0x5ae   : > { %v861_v4 = vpop.xlane.xlu1 %860 }
 0x5af   : > { %v864_v5 = vadd.f32 1e-06, %v862_v3  ;;  %v863_v6 = vmul.f32 0.03125, %v861_v4 }
 0x5b1   : > { %1628 = vrsqrt.f32 %v864_v5  ;;  %v865_v7 = vadd.f32 1e-06, %v863_v6 }
 0x5b3   : > { %1630 = vrsqrt.f32 %v865_v7 }
 0x5bb   : > { %v1629_v11 = vpop.eup %1628 }
 0x5bc   : > { %v868_v12 = vmul.f32 %v1629_v11, %v852_v55  ;;  %v1743_v11 = vmov (!%p1437_p1), 0.0  }
 0x5bd   : > { %v1631_v13 = vpop.eup %1630  ;;  %1510 = vmatprep.subr.bf16.mxu1 (!%p1437_p1), %v1743_v11 }
 0x5be   : > { %v874_v15 = vmul.f32 %v873_v9, %v868_v12  ;;  %v869_v16 = vmul.f32 %v1631_v13, %v853_v57  ;;  %v1636_v12 = vld [vmem:[%s2164_s11] sm:$0xff] (!%p1437_p1)  }
 0x5c0   : > { %v875_v18 = vmul.f32 %v873_v9, %v869_v16  ;;  %v880_v19 = vadd.f32 %v879_v17, %v874_v15 }
 0x5c2   : > { %v881_v20 = vadd.f32 %v879_v17, %v875_v18 }
 0x5c4   : > { %v882_v21 = vpack.c.bf16 %v881_v20, %v880_v19  ;;  %v1084_v20 = vld [vmem:[%s2163_s10] sm:$0x3] (!%p1437_p1) }
 0x5c5   : > { %v1114_v26 = vrot.slane (!%p1437_p1), %v1084_v20, %v777_v23  ;;  %v1120_v31 = vrot.slane (!%p1437_p1), %v1084_v20, %v783_v28  ;;  %v1637_v23 = vld [vmem:[%s2164_s11 + $0x8] sm:$0xff] (!%p1437_p1)  }
 0x5c6   : > { %1480 = vmatmul.mubr.msk.bf16.vlgmr.msra.gmra.mrb[4].mxu1 %vm747_vm2, %v882_v21 }
 0x5c7   : > { %1514 = vmatprep.mubr.msk.bf16.mxu1 (!%p1437_p1), %vm1742_vm5, %v1743_v11  ;;  %1511 = vmatpush3.bf16.msra.mxu1 (!%p1437_p1), %v1636_v12 }
 0x5c8   : > { %1512 = vmatprep.subr.bf16.mxu1 (!%p1437_p1), %v1743_v11 }
 0x5cb   : > { %1513 = vmatpush3.bf16.msra.mxu1 (!%p1437_p1), %v1637_v23 }
 0x699   : > { %v943_v33 = vpop.f32.mrb[4].mxu1 }
 0x69a   : > { %v944_v34 = vadd.f32 %v1425_v32, %v943_v33  ;;  %v1481_v35 = vpop.f32.mrb[5].mxu1 }
 0x69b   : > { %v946_v36 = vpop.f32.mrb[6].mxu1 }
 0x69c   : > { %v952_v37 = vmul.f32 0.70710677, %v944_v34  ;;  %v947_v38 = vadd.f32 %v1425_v32, %v946_v36  ;;  %v1482_v39 = vpop.f32.mrb[7].mxu1  ;;  %v950_v43 = vmul.f32 0.5, %v944_v34  ;;  %v1123_v36 = vld [vmem:[%s2200_s15] sm:$0x1] (!%p1437_p1) }
 0x69e   : > { %1632 = verf.f32 %v952_v37  ;;  %v953_v40 = vmul.f32 0.70710677, %v947_v38  ;;  %v951_v44 = vmul.f32 0.5, %v947_v38  ;;  %v1202_v38 = vld [vmem:[%s2201_s27] sm:$0x1] (!%p1437_p1) }
 0x6a0   : > { %1634 = verf.f32 %v953_v40 }
 0x6a8   : > { %v1633_v41 = vpop.eup %1632 }
 0x6a9   : > { %v956_v42 = vadd.f32 1.0, %v1633_v41 }
 0x6aa   : > { %v1635_v14 = vpop.eup %1634 }
 0x6ab   : > { %v957_v45 = vadd.f32 1.0, %v1635_v14  ;;  %v958_v47 = vmul.f32 %v956_v42, %v950_v43 }
 0x6ad   : > { %v959_v48 = vmul.f32 %v957_v45, %v951_v44 }
 0x6af   : > { %v960_v50 = vpack.c.bf16 %v959_v48, %v958_v47 }
 0x6b1   : > { %1500 = vmatmul.mubr.bf16.vlgmr.msra.gmra.mrb[0].mxu0 %v960_v50 }
 0x6b2   : > { %1507 = vmatprep.mubr.msk.f32.mxu0 (!%p1437_p1), %vm1742_vm5, %v1743_v11 }
 0x784   : > { %v1063_v55 = vpop.f32.mrb[0].mxu0 }
 0x785   : > { %v1064_v56 = vadd.f32 %v1063_v55, %v980_v53  ;;  %v1501_v57 = vpop.f32.mrb[1].mxu0 }
 0x786   : > { %v1066_v58 = vpop.f32.mrb[2].mxu0 }
 0x787   : > { %v1074_v59 = vmul.f32 %v1073_v54, %v1064_v56  ;;  %v1067_v60 = vadd.f32 %v1066_v58, %v980_v53  ;;  %v1502_v61 = vpop.f32.mrb[3].mxu0  ;;  %1083 = sbr.rel (%p1437_p1) target bundleno = 2682 (0xa7a), region = 80 }
 0x789   : > { %v1076_v62 = vadd.f32 %v1074_v59, %v2023_v46  ;;  %v1075_v63 = vmul.f32 %v1073_v54, %v1067_v60 }
 0x78b   : > { %1078 = vst.msk [vmem:[#allocation2] sm:$0xff] %vm747_vm2, %v1076_v62  ;;  %v1077_v0 = vadd.f32 %v1075_v63, %v2026_v49  ;;  %v1085_v24 = vsel (!%p1437_p1), %vm747_vm2, %v1076_v62, 0.0 }
 0x78c   : > { %1086 = vadd.xlane.f32.xlu0 (!%p1437_p1), %v1085_v24 }
 0x78d   : > { %1079 = vst.msk [vmem:[#allocation2 + $0x8] sm:$0xff] %vm747_vm2, %v1077_v0  ;;  %v1088_v1 = vsel (!%p1437_p1), %vm747_vm2, %v1077_v0, 0.0 }
 0x790   : > { %1089 = vadd.xlane.f32.xlu0 %v1088_v1 }
 0x819   : > { %v1087_v2 = vpop.xlane.xlu0 %1086 }
 0x81a   : > { %v1091_v3 = vmul.f32 0.03125, %v1087_v2 }
 0x81c   : > { %v1093_v4 = vsub.f32 %v1076_v62, %v1091_v3 }
 0x81d   : > { %v1090_v46 = vpop.xlane.xlu0 %1089 }
 0x81e   : > { %v1092_v5 = vmul.f32 0.03125, %v1090_v46  ;;  %v1095_v6 = vmul.f32 %v1093_v4, %v1093_v4 }
 0x820   : > { %v1094_v7 = vsub.f32 %v1077_v0, %v1092_v5  ;;  %v1097_v49 = vsel %vm747_vm2, %v1095_v6, 0.0 }
 0x821   : > { %1098 = vadd.xlane.f32.xlu1 %v1097_v49 }
 0x822   : > { %v1096_v8 = vmul.f32 %v1094_v7, %v1094_v7 }
 0x824   : > { %v1100_v9 = vsel %vm747_vm2, %v1096_v8, 0.0 }
 0x825   : > { %1101 = vadd.xlane.f32.xlu1 %v1100_v9 }
 0x8ae   : > { %v1099_v13 = vpop.xlane.xlu1 %1098 }
 0x8af   : > { %v1103_v15 = vmul.f32 0.03125, %v1099_v13 }
 0x8b1   : > { %v1105_v16 = vadd.f32 1e-06, %v1103_v15 }
 0x8b2   : > { %v1102_v17 = vpop.xlane.xlu1 %1101 }
 0x8b3   : > { %1638 = vrsqrt.f32 %v1105_v16  ;;  %v1104_v18 = vmul.f32 0.03125, %v1102_v17 }
 0x8b5   : > { %v1106_v19 = vadd.f32 1e-06, %v1104_v18 }
 0x8b7   : > { %1640 = vrsqrt.f32 %v1106_v19 }
 0x8bd   : > { %v1639_v21 = vpop.eup %1638 }
 0x8be   : > { %v1109_v25 = vmul.f32 %v1639_v21, %v1093_v4 }
 0x8c0   : > { %v1115_v30 = vmul.f32 %v1114_v26, %v1109_v25 }
 0x8c1   : > { %v1641_v27 = vpop.eup %1640 }
 0x8c2   : > { %v1110_v29 = vmul.f32 %v1641_v27, %v1094_v7  ;;  %v1121_v33 = vadd.f32 %v1120_v31, %v1115_v30 }
 0x8c4   : > { %v1116_v32 = vmul.f32 %v1114_v26, %v1110_v29 }
 0x8c6   : > { %v1122_v34 = vadd.f32 %v1120_v31, %v1116_v32 }
 0x8c8   : > { %v1519_v35 = vpack.c.bf16 %v1122_v34, %v1121_v33 }
 0x8ca   : > { %1520 = vmatpush3.bf16.msra.mxu0 %v1519_v35 }
 0x8cd   : > { %1508 = vmatmul.mubr.msk.f32.vlgmr.msra.gmra.mrb[0].mxu0 %vm791_vm4, %v1123_v36 }
 0x9a0   : > { %v1193_v37 = vpop.f32.mrb[0].mxu0 }
 0x9a1   : > { %v1197_v22 = vpack.c.bf16 %v1193_v37, %v1193_v37  ;;  %v1509_v28 = vpop.f32.mrb[1].mxu0 }
 0x9a3   : > { %1515 = vmatmul.mubr.msk.bf16.vlgmr.msra.gmra.mrb[0].mxu1 %vm747_vm2, %v1197_v22 }
 0xa76   : > { %v1252_v39 = vpop.f32.mrb[0].mxu1 }
 0xa77   : > { %v1253_v40 = vadd.f32 %v1252_v39, %v1202_v38  ;;  %v1516_v41 = vpop.f32.mrb[1].mxu1 }
 0xa78   : > { %v1255_v42 = vpop.f32.mrb[2].mxu1 }
 0xa79   : > { %1259 = vst.msk [vmem:[%s1925_s4] sm:$0x1] %vm1258_vm6, %v1253_v40  ;;  %v1517_v14 = vpop.f32.mrb[3].mxu1 }
 0xa7a PF: > { %s2202_s25 = sld [smem:[#allocation8_spill]]  ;;  %s1273_s16 = sshll.u32 %s1925_s4, 4  ;;  %s1274_s16 = int_to_ptr.vmem [resolvable:$true] %s1273_s16 }
 0xa7b   : > { %s2204_s0 = sld [smem:[#allocation21_spill]]  ;;  %s2205_s28 = sand.u32 1, %s1712_s26  }
 0xa7c   : > { %s1261_s18 = scalar_lea.sflag [#allocation4], %s2205_s28  ;;  %s1642_s17 = scalar_lea.vmem %s1274_s16, 16 }
 0xa7d   : > { %p1643_p2 = scmp.ne.s32.totalorder %s1274_s16, %s1642_s17  ;;  %s1744_s22 = smov [#allocation3]  }
 0xa7e   : > { %s1646_s24 = sshll.u32 %s1744_s22, 4  ;;  %s1647_s24 = int_to_ptr.vmem [resolvable:$false] %s1646_s24 }
 0xa7f   : > { %p1644_p4 = pnand %p1643_p2, %p1864_p3  ;;  %s1648_s5 = scalar_lea.vmem %s1647_s24, 32 }
 0xa80   : > { %s1442_s14 = sshll.u32 %s2202_s25, 4  ;;  %p1649_p6 = scmp.lt.s32.totalorder %s1274_s16, %s1647_s24 }
 0xa81   : > { %s2103_s13 = scalar_lea.hbm %s2204_s0, %s1442_s14  ;;  %p1645_p5 = pneg %p1644_p4 }
 0xa82   : > { %p1650_p7 = scmp.lt.s32.totalorder %s1648_s5, %s1642_s17 }
 0xa84   : > { %p1651_p8 = por %p1650_p7, %p1649_p6 }
 0xa86   : > { %p1652_p10 = pnand %p1651_p8, %p1645_p5 }
 0xa88   : > { %1655 = shalt.err (!%p1652_p10)
}
 0xa89   : > { %s1656_s4 = scalar_lea.hbm %s2103_s13, 16  ;;  %s1660_s21 = scalar_lea.hbm %s2204_s0, 32 }
 0xa8a   : > { %p1657_p11 = scmp.ne.s32.totalorder %s2103_s13, %s1656_s4  ;;  %p1661_p0 = scmp.lt.u32.totalorder %s2103_s13, %s2204_s0 }
 0xa8b   : > { %p1662_p1 = scmp.lt.u32.totalorder %s1660_s21, %s1656_s4  ;;  %p1664_p4 = scmp.lt.u32.totalorder %s1656_s4, %s2103_s13 }
 0xa8c   : > { %p1658_p12 = pnand %p1657_p11, %p1864_p3 }
 0xa8d   : > { %p1663_p2 = por %p1662_p1, %p1661_p0 }
 0xa8e   : > { %p1659_p13 = pneg %p1658_p12 }
 0xa8f   : > { %p1665_p5 = por %p1664_p4, %p1663_p2 }
 0xa91   : > { %p1666_p6 = pnand %p1665_p5, %p1659_p13 }
 0xa93   : > { %1669 = shalt.err (!%p1666_p6)
}
 0xa94   : > { %1521 = dma.vmem_to_hbm [thread:$0]  (%p1864_p3), %s1274_s16, 16, %s2103_s13, %s1261_s18  }
 0xa95 PF: > { %s2206_s27 = sld [smem:[#allocation11_spill]]  ;;  %s2207_s25 = sld [smem:[#allocation6_spill]] }
 0xa9b   : > { %p1527_p7 = scmp.ge.s32.totalorder %s2206_s27, 2  ;;  %s1285_s12 = sand.u32 1, %s2207_s25  }
 0xa9c   : > { %s1286_s30 = scalar_lea.sflag [#allocation4], %s1285_s12 }
 0xa9d   : > { %p1524_p8 = pnand %p1527_p7, %p1874_p9 }
 0xa9f   : > { %1703 = dma.done.wait (!%p1524_p8), %s1286_s30, 16  }
 0xaa0   : > { %1705 = vsyncadd (!%p1524_p8), %s1286_s30, 4294967280  ;;  %s26_s15 = sadd.s32 1, %s2206_s27   ;;  %s2209_s28 = sld [smem:[#allocation7_spill]] }
 0xaa1   : > { %p23_p10 = scmp.ge.s32.totalorder %s26_s15, 6   ;;  %s2210_s27 = sld [smem:[#allocation16_spill]] }
 0xaa2   : > { %s2211_s29 = sld [smem:[#allocation9_spill]]  ;;  %s2212_s17 = sld [smem:[#allocation10_spill]] }
 0xaa3   : > { %s2213_s30 = sld [smem:[#allocation12_spill]]  ;;  %s2214_s14 = sld [smem:[#allocation14_spill]] }
 0xaa4   : > { %s2215_s25 = smov %s1712_s26  ;;  %25 = sbr.rel (!%p23_p10) target bundleno = 11 (0xb), region = 130 }
 0xaa6   : > { %s2216_s26 = smov %s2209_s28 }
 0xaa8   : > { %s2217_s28 = smov %s2211_s29  ;;  %s2218_s29 = smov %s2212_s17 }
 0xaab   :  { %1290 = vsyncpa [#allocation4], 1 }
 0xaac   :  { %1292 = vsyncpa [#allocation4 + $0x1], 1 }

</bundles_post_ra>
